<compile_context>
chip_gen: v6e
topology: v6e:2x2x1
jax: 0.10.0
libtpu: 0.0.40
codegen_flags: <defaults>
</compile_context>

<pallas_src>
import functools

import jax
import jax.numpy as jnp
from jax import lax
from jax.experimental import pallas as pl
from jax.experimental.pallas import tpu as pltpu


def _hash32(x):
    """splitmix32-style 32-bit finalizer; uniform bits from a counter."""
    x = x ^ (x >> 16)
    x = x * jnp.uint32(0x7FEB352D)
    x = x ^ (x >> 15)
    x = x * jnp.uint32(0x846CA68B)
    x = x ^ (x >> 16)
    return x


def _projection_head_kernel(seed_ref, x_ref, w1_ref, w2_ref, o_ref,
                            *, dropout_p, training, tm, hidden):
    # x_ref:  (tm, in_dim)       VMEM
    # w1_ref: (in_dim, hidden)   VMEM (full, resident across grid)
    # w2_ref: (hidden, out_dim)  VMEM (full, resident across grid)
    # o_ref:  (tm, out_dim)      VMEM
    h = jnp.dot(x_ref[...], w1_ref[...], preferred_element_type=jnp.float32)
    h = jnp.maximum(h, 0.0)  # ReLU

    if training and dropout_p > 0.0:
        # F.dropout semantics: drop with prob p, scale kept values by 1/(1-p).
        # Counter-based PRNG: unique 32-bit counter per (absolute row, col),
        # mixed with the runtime seed, hashed to uniform bits, then an integer
        # threshold compare (no float conversion on the VALU path).
        row = lax.broadcasted_iota(jnp.uint32, h.shape, 0)
        col = lax.broadcasted_iota(jnp.uint32, h.shape, 1)
        tile_base = (pl.program_id(0) * tm).astype(jnp.uint32)
        ctr = (row + tile_base) * jnp.uint32(hidden) + col
        seed_mix = seed_ref[0].astype(jnp.uint32) * jnp.uint32(0x9E3779B9)
        bits = _hash32(ctr + seed_mix)

        threshold = min(int(round(dropout_p * (2 ** 32))), 2 ** 32 - 1)
        keep = bits >= jnp.uint32(threshold)
        scale = jnp.float32(1.0 / (1.0 - dropout_p))
        h = jnp.where(keep, h * scale, jnp.zeros_like(h))

    o_ref[...] = jnp.dot(h, w2_ref[...],
                         preferred_element_type=jnp.float32).astype(o_ref.dtype)


def projection_head(x, w1, w2, *, dropout_p=0.0, training=False, seed=0, tm=None):
    """x: (N, in_dim); w1: (in_dim, hidden); w2: (hidden, out).  Returns (N, out)."""
    N, in_dim = x.shape
    hidden = w1.shape[1]
    out_dim = w2.shape[1]

    if tm is None:
        # Large row tile to amortize per-grid-step overhead and fill the MXU M
        # dimension; tiny inputs run as a single grid step (block == full dim).
        tm = min(N, 512)
    tm = min(tm, N)
    grid = (pl.cdiv(N, tm),)

    seed_arr = jnp.asarray([seed], dtype=jnp.int32)

    kernel = functools.partial(_projection_head_kernel,
                               dropout_p=float(dropout_p),
                               training=bool(training),
                               tm=int(tm),
                               hidden=int(hidden))

    grid_spec = pltpu.PrefetchScalarGridSpec(
        num_scalar_prefetch=1,
        grid=grid,
        in_specs=[
            pl.BlockSpec((tm, in_dim), lambda i, seed: (i, 0)),
            pl.BlockSpec((in_dim, hidden), lambda i, seed: (0, 0)),
            pl.BlockSpec((hidden, out_dim), lambda i, seed: (0, 0)),
        ],
        out_specs=pl.BlockSpec((tm, out_dim), lambda i, seed: (i, 0)),
    )

    return pl.pallas_call(
        kernel,
        out_shape=jax.ShapeDtypeStruct((N, out_dim), x.dtype),
        grid_spec=grid_spec,
        compiler_params=pltpu.CompilerParams(
            # Tiles are independent (seed + absolute-row hashing), so the grid
            # can shard across TensorCores (pays off on v7x, neutral elsewhere).
            dimension_semantics=("parallel",),
            vmem_limit_bytes=64 * 1024 * 1024,
        ),
    )(seed_arr, x, w1, w2)


if __name__ == "__main__":
    # Small shapes consistent with ProjectionHead(in_dim=32, hidden=64, out=16, dropout=0.1)
    N, in_dim, hidden_dim, out_dim = 16, 32, 64, 16
    dropout = 0.1

    key = jax.random.PRNGKey(0)
    kx, k1, k2 = jax.random.split(key, 3)

    x = jax.random.normal(kx, (N, in_dim), dtype=jnp.float32)
    # Deterministic param init (kaiming-uniform-ish scale, like nn.Linear default).
    w1 = jax.random.uniform(k1, (in_dim, hidden_dim), dtype=jnp.float32,
                            minval=-1.0, maxval=1.0) * (1.0 / jnp.sqrt(in_dim))
    w2 = jax.random.uniform(k2, (hidden_dim, out_dim), dtype=jnp.float32,
                            minval=-1.0, maxval=1.0) * (1.0 / jnp.sqrt(hidden_dim))

    # Eval path (dropout = identity): deterministic, check against pure-JAX reference.
    out_eval = projection_head(x, w1, w2, dropout_p=dropout, training=False)
    out_eval = jax.block_until_ready(out_eval)
    ref = jnp.maximum(x @ w1, 0.0) @ w2
    assert jnp.allclose(out_eval, ref, atol=1e-5, rtol=1e-5), "eval-mode mismatch"

    # Training path (stochastic dropout via in-kernel counter hash PRNG).
    out_train = projection_head(x, w1, w2, dropout_p=dropout, training=True, seed=1234)
    out_train = jax.block_until_ready(out_train)
    assert out_train.shape == (N, out_dim)
    assert bool(jnp.all(jnp.isfinite(out_train)))

    # Same seed -> identical output (deterministic counter-based dropout).
    out_train2 = jax.block_until_ready(
        projection_head(x, w1, w2, dropout_p=dropout, training=True, seed=1234))
    assert jnp.array_equal(out_train, out_train2)

    print("KERNEL_OK")
</pallas_src>

<mosaic_0001>
module attributes {stable_mosaic.version = 11 : i64} {
  func.func @_projection_head_kernel(%arg0: i32, %arg1: memref<1xi32, #tpu.memory_space<smem>>, %arg2: memref<16x32xf32, #tpu.memory_space<vmem>>, %arg3: memref<32x64xf32, #tpu.memory_space<vmem>>, %arg4: memref<64x16xf32, #tpu.memory_space<vmem>>, %arg5: memref<16x16xf32, #tpu.memory_space<vmem>>) attributes {dimension_semantics = [#tpu.dimension_semantics<parallel>], iteration_bounds = array<i64: 1>, scalar_prefetch = 1 : i64, scratch_operands = 0 : i64, tpu.core_type = #tpu.core_type<tc>, window_params = [{transform_indices = @transform_0, window_bounds = array<i64: 16, 32>}, {pipeline_mode = #tpu.pipeline_mode<synchronous>, transform_indices = @transform_1, window_bounds = array<i64: 32, 64>}, {pipeline_mode = #tpu.pipeline_mode<synchronous>, transform_indices = @transform_2, window_bounds = array<i64: 64, 16>}, {transform_indices = @transform_3, window_bounds = array<i64: 16, 16>}]} {
    %c0 = arith.constant 0 : index
    %c0_0 = arith.constant 0 : index
    %0 = vector.load %arg2[%c0, %c0_0] : memref<16x32xf32, #tpu.memory_space<vmem>>, vector<16x32xf32>
    %c0_1 = arith.constant 0 : index
    %c0_2 = arith.constant 0 : index
    %1 = vector.load %arg3[%c0_1, %c0_2] : memref<32x64xf32, #tpu.memory_space<vmem>>, vector<32x64xf32>
    %cst = arith.constant dense<0.000000e+00> : vector<16x64xf32>
    %2 = tpu.matmul %0, %1, %cst {dimension_numbers = #tpu.dot_dimension_numbers<[1], [0], [0], [1], [0, 0, 1, 1], [], []>} : vector<16x32xf32>, vector<32x64xf32>, vector<16x64xf32> -> vector<16x64xf32>
    %cst_3 = arith.constant 0.000000e+00 : f32
    %3 = vector.broadcast %cst_3 : f32 to vector<16x64xf32>
    %4 = arith.maximumf %2, %3 : vector<16x64xf32>
    %c0_4 = arith.constant 0 : index
    %c0_5 = arith.constant 0 : index
    %5 = vector.load %arg4[%c0_4, %c0_5] : memref<64x16xf32, #tpu.memory_space<vmem>>, vector<64x16xf32>
    %cst_6 = arith.constant dense<0.000000e+00> : vector<16x16xf32>
    %6 = tpu.matmul %4, %5, %cst_6 {dimension_numbers = #tpu.dot_dimension_numbers<[1], [0], [0], [1], [0, 0, 1, 1], [], []>} : vector<16x64xf32>, vector<64x16xf32>, vector<16x16xf32> -> vector<16x16xf32>
    %c0_7 = arith.constant 0 : index
    %c0_8 = arith.constant 0 : index
    %7 = vector.load %arg5[%c0_7, %c0_8] : memref<16x16xf32, #tpu.memory_space<vmem>>, vector<16x16xf32>
    tpu.vector_store %arg5[%c0_7, %c0_8], %6 {strides = array<i32>} : memref<16x16xf32, #tpu.memory_space<vmem>>, vector<16x16xf32>,
    return
  }
  func.func @transform_0(%arg0: i32, %arg1: memref<1xi32, #tpu.memory_space<smem>>) -> (i32, i32) {
    %c0_i32 = arith.constant 0 : i32
    %c0_i32_0 = arith.constant 0 : i32
    return %arg0, %c0_i32 : i32, i32
  }
  func.func @transform_1(%arg0: i32, %arg1: memref<1xi32, #tpu.memory_space<smem>>) -> (i32, i32) {
    %c0_i32 = arith.constant 0 : i32
    %c0_i32_0 = arith.constant 0 : i32
    %c0_i32_1 = arith.constant 0 : i32
    return %c0_i32, %c0_i32_0 : i32, i32
  }
  func.func @transform_2(%arg0: i32, %arg1: memref<1xi32, #tpu.memory_space<smem>>) -> (i32, i32) {
    %c0_i32 = arith.constant 0 : i32
    %c0_i32_0 = arith.constant 0 : i32
    %c0_i32_1 = arith.constant 0 : i32
    return %c0_i32, %c0_i32_0 : i32, i32
  }
  func.func @transform_3(%arg0: i32, %arg1: memref<1xi32, #tpu.memory_space<smem>>) -> (i32, i32) {
    %c0_i32 = arith.constant 0 : i32
    %c0_i32_0 = arith.constant 0 : i32
    return %arg0, %c0_i32 : i32, i32
  }
}

</mosaic_0001>

<bundles_post_ra>
// kernel: tpu_custom_call.1
= control target key start
LH: loop header
LB: loop body
LE: loop exit
PB: predicated region body
PF: predicated region fallthrough
CT: control target
= control target key end

     0   :  { %vm23_vm0 = vcmask 261120   ;;  %s366_s0 = inlined_call_operand.<no memory space> [shape: s32[1], index: 0, kind: input, shape index: {}]   ;;  %s367_s1 = inlined_call_operand.vmem [shape: f32[16,32], index: 1, kind: input, shape index: {}]   ;;  %s368_s2 = inlined_call_operand.vmem [shape: f32[32,64], index: 2, kind: input, shape index: {}]   ;;  %s369_s3 = inlined_call_operand.vmem [shape: f32[64,16], index: 3, kind: input, shape index: {}]   ;;  %s370_s4 = inlined_call_operand.hbm [shape: f32[16,16], index: 4, kind: output, shape index: {}]  }
   0x1   :  { %v22_v0 = vld [vmem:[%s368_s2 + $0x18] sm:$0xff]  ;;  %v21_v1 = vld [vmem:[%s368_s2 + $0x10] sm:$0xff]  ;;  %v17_v2 = vld [vmem:[%s367_s1] sm:$0xff] }
   0x2   :  { %236 = vmatprep.subr.mxu0 %v22_v0  ;;  %v20_v3 = vld [vmem:[%s368_s2 + $0x8] sm:$0xff]  ;;  %244 = vmatprep.mubr.msk.f32.mxu0 %vm23_vm0, %v17_v2  ;;  %v114_v4 = vld [vmem:[%s369_s3 + $0x38] sm:$0xff]  ;;  %v113_v5 = vld [vmem:[%s369_s3 + $0x30] sm:$0xff] }
   0x3   :  { %237 = vmatpush3.msra.mxu0 %v22_v0  ;;  %247 = vmatprep.subr.mxu1 %v114_v4 }
   0x4   :  { %238 = vmatprep.subr.mxu0 %v21_v1 }
   0x5   :  { %10 = vsyncpa [#allocation5], 0  ;;  %239 = vmatpush3.msra.mxu0 %v21_v1  ;;  %v19_v6 = vld [vmem:[%s368_s2] sm:$0xff]  ;;  %248 = vmatpush3.msra.mxu1 %v114_v4  ;;  %v112_v7 = vld [vmem:[%s369_s3 + $0x28] sm:$0xff]  ;;  %vm115_vm1 = vcmask 523264   ;;  %s291_s14 = smov [#allocation4]  }
   0x6   :  { %240 = vmatprep.subr.mxu0 %v20_v3  ;;  %249 = vmatprep.subr.mxu1 %v113_v5  ;;  %v18_v8 = vld [vmem:[%s367_s1 + $0x8] sm:$0xff]  ;;  %v111_v9 = vld [vmem:[%s369_s3 + $0x20] sm:$0xff]  ;;  %v110_v10 = vld [vmem:[%s369_s3 + $0x18] sm:$0xff]  ;;  %s205_s15 = sshll.u32 %s291_s14, 4  ;;  %vm197_vm2 = vcmask 130048   ;;  %s206_s15 = int_to_ptr.vmem [resolvable:$true] %s205_s15 }
   0x7   :  { %241 = vmatpush3.msra.mxu0 %v20_v3  ;;  %250 = vmatpush3.msra.mxu1 %v113_v5  ;;  %v109_v11 = vld [vmem:[%s369_s3 + $0x10] sm:$0xff]  ;;  %v108_v12 = vld [vmem:[%s369_s3 + $0x8] sm:$0xff]  ;;  %v107_v13 = vld [vmem:[%s369_s3] sm:$0xff]  ;;  %s269_s16 = scalar_lea.vmem %s206_s15, 256  ;;  %p274_p1 = scmp.lt.s32.totalorder %s206_s15, %s206_s15 }
   0x8   :  { %242 = vmatprep.subr.mxu0 %v19_v6  ;;  %251 = vmatprep.subr.mxu1 %v112_v7  ;;  %p270_p0 = scmp.ne.s32.totalorder %s206_s15, %s269_s16  ;;  %p275_p2 = scmp.lt.s32.totalorder %s269_s16, %s269_s16 }
   0x9   :  { %243 = vmatpush3.msra.mxu0 %v19_v6  ;;  %252 = vmatpush3.msra.mxu1 %v112_v7 }
   0xa   :  { %245 = vmatmul.mubr.msk.f32.vlgmr.msra.gmra.mxu0 %vm23_vm0, %v18_v8  ;;  %253 = vmatprep.subr.mxu1 %v111_v9  ;;  %p276_p3 = por %p275_p2, %p274_p1 }
   0xb   :  { %254 = vmatpush3.msra.mxu1 %v111_v9 }
   0xc   :  { %255 = vmatprep.subr.mxu1 %v110_v10  ;;  %p277_p4 = pnand %p276_p3, %p270_p0 }
   0xd   :  { %256 = vmatpush3.msra.mxu1 %v110_v10 }
   0xe   :  { %257 = vmatprep.subr.mxu1 %v109_v11 }
   0xf   :  { %258 = vmatpush3.msra.mxu1 %v109_v11 }
  0x10   :  { %259 = vmatprep.subr.mxu1 %v108_v12 }
  0x11   :  { %260 = vmatpush3.msra.mxu1 %v108_v12 }
  0x12   :  { %261 = vmatprep.subr.mxu1 %v107_v13 }
  0x13   :  { %262 = vmatpush3.msra.mxu1 %v107_v13 }
  0xca   :  { %v246_v14 = vpop.f32.mrf.mxu0 }
  0xcb   :  { %v106_v17 = vmax.f32 %v246_v14, 0.0 }
  0xcc   :  { %v96_v15 = vpop.f32.mrf.mxu0 }
  0xcd   :  { %v105_v16 = vmax.f32 %v96_v15, 0.0 }
  0xcf   :  { %263 = vmatprep.mubr.msk.f32.mxu1 %vm115_vm1, %v105_v16 }
  0xd0   :  { %264 = vmatmul.mubr.msk.f32.vlgmr.msra.gmra.mxu1 %vm115_vm1, %v106_v17 }
 0x190   :  { %v265_v18 = vpop.f32.mrf.mxu1 }
 0x191   :  { %199 = vst.msk [vmem:[#allocation4 + $0x8] sm:$0xff] %vm197_vm2, %v265_v18 }
 0x192   :  { %v188_v19 = vpop.f32.mrf.mxu1 }
 0x193   :  { %198 = vst.msk [vmem:[#allocation4] sm:$0xff] %vm197_vm2, %v188_v19 }
 0x194   :  { %280 = shalt.err (!%p277_p4)
}
 0x195   :  { %s292_s3 = smov 128   ;;  %s293_s17 = smov 8  }
 0x196   :  { %211 = dma.vmem_to_hbm [thread:$0]  %s206_s15, 256, %s370_s4, [#allocation5], %s292_s3, %s292_s3, %s293_s17  }
 0x197   :  { %289 = dma.done.wait [#allocation5], 256  }
 0x198   :  { %290 = vsyncadd [#allocation5], 4294967040 }
 0x199   :  { %215 = vsyncpa [#allocation5], 1 }

</bundles_post_ra>
